<compile_context>
chip_gen: v5e
topology: v5e:2x2
jax: 0.10.0
libtpu: 0.0.40
codegen_flags: <defaults>
</compile_context>

<pallas_src>
import jax
import jax.numpy as jnp
from jax.experimental import pallas as pl
from jax.experimental.pallas import tpu as pltpu

IN_F = 9
HID = 60
OUT_F = 2
N_HID = 5  # fc2..fc6 (the 60x60 layers)


def _mlp_kernel(x_ref, w1_ref, b1_ref, wh_ref, bh_ref, w7_ref, b7_ref, o_ref):
    cdt = w1_ref.dtype  # MXU input dtype (float32 or bfloat16)

    # fc1 + ReLU : [HID, IN_F] @ [IN_F, tile] -> [HID, tile]  (batch on the lane axis)
    h = jnp.dot(w1_ref[...], x_ref[...].astype(cdt),
                preferred_element_type=jnp.float32)
    h = jnp.maximum(h + b1_ref[...], 0.0)

    # fc2..fc6 + ReLU (dropout1 after fc3/fc4 is identity in eval mode)
    for k in range(N_HID):  # static unroll over the stacked [5, HID, HID] weights
        y = jnp.dot(wh_ref[k], h.astype(cdt), preferred_element_type=jnp.float32)
        h = jnp.maximum(y + bh_ref[k], 0.0)

    # fc7 : [OUT_F, HID] @ [HID, tile] -> [2, tile]
    logits = jnp.dot(w7_ref[...], h.astype(cdt),
                     preferred_element_type=jnp.float32) + b7_ref[...]

    # 2-class softmax in closed form: p1 = sigmoid(l1 - l0), p0 = 1 - p1.
    # No cross-lane reduction, no approx reciprocal -> rows sum to 1 to f32 roundoff.
    d = logits[1:2, :] - logits[0:1, :]          # [1, tile]
    p1 = 1.0 / (1.0 + jnp.exp(-d))
    o_ref[...] = jnp.concatenate([1.0 - p1, p1], axis=0).astype(o_ref.dtype)


def _round_up(n, m):
    return ((n + m - 1) // m) * m


def mlp_forward(x, params, *, batch_tile=512, use_bf16=True, num_cores=1):
    """x: [B, 9] float32 -> [B, 2] softmax probabilities.

    batch_tile: lane-dim tile (forced to a multiple of 128 when B > batch_tile).
    use_bf16:   bf16 MXU inputs (weights + per-layer activation casts), f32 accumulation
                and f32 bias/ReLU/softmax. ~3x fewer MXU passes on v5e/v6e/v7x.
    num_cores:  2 on v7x (two TensorCores) enables a two-way split for mid-size batches;
                keep 1 on v5e/v6e where the grid is a serial loop.
    """
    B = x.shape[0]

    # ---- choose the batch (lane) tile --------------------------------------
    batch_tile = max(128, _round_up(batch_tile, 128))
    if B > batch_tile:
        tile = batch_tile                       # 128-aligned; Pallas handles the partial tail
    elif num_cores >= 2 and B >= 256:
        tile = _round_up(-(-B // 2), 128)       # v7x: both cores get >=128 rows
    else:
        tile = B                                # single full-batch block
    grid = (pl.cdiv(B, tile),)

    # ---- pack weights (PyTorch [out, in] layout; batch is the lane/N dim) ---
    # (In production this packing would be hoisted/jitted once, not per call.)
    wdt = jnp.bfloat16 if use_bf16 else jnp.float32
    w1 = params["w1"].astype(wdt)                                     # [HID, IN_F]
    b1 = params["b1"].reshape(HID, 1).astype(jnp.float32)             # [HID, 1]
    wh = jnp.stack([params[f"w{i}"] for i in range(2, 2 + N_HID)]).astype(wdt)      # [5,HID,HID]
    bh = jnp.stack([params[f"b{i}"].reshape(HID, 1)
                    for i in range(2, 2 + N_HID)]).astype(jnp.float32)              # [5,HID,1]
    w7 = params["w7"].astype(wdt)                                     # [OUT_F, HID]
    b7 = params["b7"].reshape(OUT_F, 1).astype(jnp.float32)           # [OUT_F, 1]

    x_t = x.T  # [IN_F, B] -- tiny transpose so the batch rides the lane axis of every dot

    def const_spec(a):  # full-array block, constant index_map -> DMA'd once
        nd = a.ndim
        return pl.BlockSpec(a.shape, lambda i, _n=nd: (0,) * _n)

    in_specs = [
        pl.BlockSpec((IN_F, tile), lambda i: (0, i)),
        const_spec(w1), const_spec(b1), const_spec(wh),
        const_spec(bh), const_spec(w7), const_spec(b7),
    ]
    out_spec = pl.BlockSpec((OUT_F, tile), lambda i: (0, i))

    out_t = pl.pallas_call(
        _mlp_kernel,
        out_shape=jax.ShapeDtypeStruct((OUT_F, B), jnp.float32),
        grid=grid,
        in_specs=in_specs,
        out_specs=out_spec,
        compiler_params=pltpu.CompilerParams(
            dimension_semantics=("parallel",)),
    )(x_t, w1, b1, wh, bh, w7, b7)

    return out_t.T  # [B, OUT_F]


def init_params(key):
    """PyTorch nn.Linear default init; weights stored [out_features, in_features]."""
    dims = [(IN_F, HID)] + [(HID, HID)] * N_HID + [(HID, OUT_F)]
    params = {}
    keys = jax.random.split(key, 2 * len(dims))
    for li, (fan_in, fan_out) in enumerate(dims, start=1):
        bound = 1.0 / float(fan_in) ** 0.5
        params[f"w{li}"] = jax.random.uniform(
            keys[2 * (li - 1)], (fan_out, fan_in), jnp.float32, -bound, bound)
        params[f"b{li}"] = jax.random.uniform(
            keys[2 * li - 1], (fan_out,), jnp.float32, -bound, bound)
    return params


def reference_forward(x, params):
    h = x
    for li in range(1, 7):
        h = jnp.maximum(h @ params[f"w{li}"].T + params[f"b{li}"], 0.0)
    logits = h @ params["w7"].T + params["b7"]
    return jax.nn.softmax(logits, axis=-1)


if __name__ == "__main__":
    key = jax.random.PRNGKey(0)
    k_p, k_x, k_x2, k_x3 = jax.random.split(key, 4)
    params = init_params(k_p)

    # 1) small batch (matches the module's [B, 9] input), exact-f32 path
    B = 8
    x = jax.random.normal(k_x, (B, IN_F), jnp.float32)
    out = jax.block_until_ready(mlp_forward(x, params, use_bf16=False))
    ref = reference_forward(x, params)
    assert out.shape == (B, OUT_F)
    assert jnp.allclose(out, ref, atol=2e-3, rtol=2e-3), "mismatch vs JAX reference (f32)"
    assert jnp.allclose(jnp.sum(out, axis=-1), 1.0, atol=1e-4), "softmax rows must sum to 1"

    # 2) mid batch: single full-batch block (f32) and the gated v7x two-way split
    #    (grid=2 with a partial tail block).
    B2 = 300
    x2 = jax.random.normal(k_x2, (B2, IN_F), jnp.float32)
    ref2 = reference_forward(x2, params)
    out2 = jax.block_until_ready(mlp_forward(x2, params, use_bf16=False))
    assert out2.shape == (B2, OUT_F)
    assert jnp.allclose(out2, ref2, atol=2e-3, rtol=2e-3), "mismatch vs JAX reference (f32, mid batch)"
    out2s = jax.block_until_ready(mlp_forward(x2, params, use_bf16=False, num_cores=2))
    assert jnp.allclose(out2s, ref2, atol=2e-3, rtol=2e-3), "mismatch vs JAX reference (split tiles)"

    # 3) multi-step grid (3 blocks of 512/512/176) on the default bf16 fast path
    B3 = 1200
    x3 = jax.random.normal(k_x3, (B3, IN_F), jnp.float32)
    ref3 = reference_forward(x3, params)
    out3 = jax.block_until_ready(mlp_forward(x3, params, batch_tile=512))  # bf16 default
    assert out3.shape == (B3, OUT_F)
    assert jnp.allclose(out3, ref3, atol=5e-2, rtol=5e-2), "mismatch vs JAX reference (bf16, tiled)"
    assert jnp.allclose(jnp.sum(out3, axis=-1), 1.0, atol=1e-4)

    print("KERNEL_OK")
</pallas_src>

<mosaic_0001>
module attributes {stable_mosaic.version = 11 : i64} {
  func.func @_mlp_kernel(%arg0: i32, %arg1: memref<9x8xf32, #tpu.memory_space<vmem>>, %arg2: memref<60x9xf32, #tpu.memory_space<vmem>>, %arg3: memref<60x1xf32, #tpu.memory_space<vmem>>, %arg4: memref<5x60x60xf32, #tpu.memory_space<vmem>>, %arg5: memref<5x60x1xf32, #tpu.memory_space<vmem>>, %arg6: memref<2x60xf32, #tpu.memory_space<vmem>>, %arg7: memref<2x1xf32, #tpu.memory_space<vmem>>, %arg8: memref<2x8xf32, #tpu.memory_space<vmem>>) attributes {dimension_semantics = [#tpu.dimension_semantics<parallel>], iteration_bounds = array<i64: 1>, scalar_prefetch = 0 : i64, scratch_operands = 0 : i64, tpu.core_type = #tpu.core_type<tc>, window_params = [{transform_indices = @transform_0, window_bounds = array<i64: 9, 8>}, {pipeline_mode = #tpu.pipeline_mode<synchronous>, transform_indices = @transform_1, window_bounds = array<i64: 60, 9>}, {pipeline_mode = #tpu.pipeline_mode<synchronous>, transform_indices = @transform_2, window_bounds = array<i64: 60, 1>}, {pipeline_mode = #tpu.pipeline_mode<synchronous>, transform_indices = @transform_3, window_bounds = array<i64: 5, 60, 60>}, {pipeline_mode = #tpu.pipeline_mode<synchronous>, transform_indices = @transform_4, window_bounds = array<i64: 5, 60, 1>}, {pipeline_mode = #tpu.pipeline_mode<synchronous>, transform_indices = @transform_5, window_bounds = array<i64: 2, 60>}, {pipeline_mode = #tpu.pipeline_mode<synchronous>, transform_indices = @transform_6, window_bounds = array<i64: 2, 1>}, {transform_indices = @transform_7, window_bounds = array<i64: 2, 8>}]} {
    %c0 = arith.constant 0 : index
    %c0_0 = arith.constant 0 : index
    %0 = vector.load %arg2[%c0, %c0_0] : memref<60x9xf32, #tpu.memory_space<vmem>>, vector<60x9xf32>
    %c0_1 = arith.constant 0 : index
    %c0_2 = arith.constant 0 : index
    %1 = vector.load %arg1[%c0_1, %c0_2] : memref<9x8xf32, #tpu.memory_space<vmem>>, vector<9x8xf32>
    %cst = arith.constant dense<0.000000e+00> : vector<60x8xf32>
    %2 = tpu.matmul %0, %1, %cst {dimension_numbers = #tpu.dot_dimension_numbers<[1], [0], [0], [1], [0, 0, 1, 1], [], []>} : vector<60x9xf32>, vector<9x8xf32>, vector<60x8xf32> -> vector<60x8xf32>
    %c0_3 = arith.constant 0 : index
    %c0_4 = arith.constant 0 : index
    %3 = vector.load %arg3[%c0_3, %c0_4] : memref<60x1xf32, #tpu.memory_space<vmem>>, vector<60x1xf32>
    %4 = vector.broadcast %3 : vector<60x1xf32> to vector<60x8xf32>
    %5 = arith.addf %2, %4 : vector<60x8xf32>
    %cst_5 = arith.constant 0.000000e+00 : f32
    %6 = vector.broadcast %cst_5 : f32 to vector<60x8xf32>
    %7 = arith.maximumf %5, %6 : vector<60x8xf32>
    %c0_6 = arith.constant 0 : index
    %c0_7 = arith.constant 0 : index
    %c0_8 = arith.constant 0 : index
    %8 = vector.load %arg4[%c0_6, %c0_7, %c0_8] : memref<5x60x60xf32, #tpu.memory_space<vmem>>, vector<1x60x60xf32>
    %9 = vector.shape_cast %8 : vector<1x60x60xf32> to vector<60x60xf32>
    %cst_9 = arith.constant dense<0.000000e+00> : vector<60x8xf32>
    %10 = tpu.matmul %9, %7, %cst_9 {dimension_numbers = #tpu.dot_dimension_numbers<[1], [0], [0], [1], [0, 0, 1, 1], [], []>} : vector<60x60xf32>, vector<60x8xf32>, vector<60x8xf32> -> vector<60x8xf32>
    %c0_10 = arith.constant 0 : index
    %c0_11 = arith.constant 0 : index
    %c0_12 = arith.constant 0 : index
    %11 = vector.load %arg5[%c0_10, %c0_11, %c0_12] : memref<5x60x1xf32, #tpu.memory_space<vmem>>, vector<1x60x1xf32>
    %12 = vector.shape_cast %11 : vector<1x60x1xf32> to vector<60x1xf32>
    %13 = vector.broadcast %12 : vector<60x1xf32> to vector<60x8xf32>
    %14 = arith.addf %10, %13 : vector<60x8xf32>
    %cst_13 = arith.constant 0.000000e+00 : f32
    %15 = vector.broadcast %cst_13 : f32 to vector<60x8xf32>
    %16 = arith.maximumf %14, %15 : vector<60x8xf32>
    %c1 = arith.constant 1 : index
    %c0_14 = arith.constant 0 : index
    %c0_15 = arith.constant 0 : index
    %17 = vector.load %arg4[%c1, %c0_14, %c0_15] : memref<5x60x60xf32, #tpu.memory_space<vmem>>, vector<1x60x60xf32>
    %18 = vector.shape_cast %17 : vector<1x60x60xf32> to vector<60x60xf32>
    %cst_16 = arith.constant dense<0.000000e+00> : vector<60x8xf32>
    %19 = tpu.matmul %18, %16, %cst_16 {dimension_numbers = #tpu.dot_dimension_numbers<[1], [0], [0], [1], [0, 0, 1, 1], [], []>} : vector<60x60xf32>, vector<60x8xf32>, vector<60x8xf32> -> vector<60x8xf32>
    %c1_17 = arith.constant 1 : index
    %c0_18 = arith.constant 0 : index
    %c0_19 = arith.constant 0 : index
    %20 = vector.load %arg5[%c1_17, %c0_18, %c0_19] : memref<5x60x1xf32, #tpu.memory_space<vmem>>, vector<1x60x1xf32>
    %21 = vector.shape_cast %20 : vector<1x60x1xf32> to vector<60x1xf32>
    %22 = vector.broadcast %21 : vector<60x1xf32> to vector<60x8xf32>
    %23 = arith.addf %19, %22 : vector<60x8xf32>
    %cst_20 = arith.constant 0.000000e+00 : f32
    %24 = vector.broadcast %cst_20 : f32 to vector<60x8xf32>
    %25 = arith.maximumf %23, %24 : vector<60x8xf32>
    %c2 = arith.constant 2 : index
    %c0_21 = arith.constant 0 : index
    %c0_22 = arith.constant 0 : index
    %26 = vector.load %arg4[%c2, %c0_21, %c0_22] : memref<5x60x60xf32, #tpu.memory_space<vmem>>, vector<1x60x60xf32>
    %27 = vector.shape_cast %26 : vector<1x60x60xf32> to vector<60x60xf32>
    %cst_23 = arith.constant dense<0.000000e+00> : vector<60x8xf32>
    %28 = tpu.matmul %27, %25, %cst_23 {dimension_numbers = #tpu.dot_dimension_numbers<[1], [0], [0], [1], [0, 0, 1, 1], [], []>} : vector<60x60xf32>, vector<60x8xf32>, vector<60x8xf32> -> vector<60x8xf32>
    %c2_24 = arith.constant 2 : index
    %c0_25 = arith.constant 0 : index
    %c0_26 = arith.constant 0 : index
    %29 = vector.load %arg5[%c2_24, %c0_25, %c0_26] : memref<5x60x1xf32, #tpu.memory_space<vmem>>, vector<1x60x1xf32>
    %30 = vector.shape_cast %29 : vector<1x60x1xf32> to vector<60x1xf32>
    %31 = vector.broadcast %30 : vector<60x1xf32> to vector<60x8xf32>
    %32 = arith.addf %28, %31 : vector<60x8xf32>
    %cst_27 = arith.constant 0.000000e+00 : f32
    %33 = vector.broadcast %cst_27 : f32 to vector<60x8xf32>
    %34 = arith.maximumf %32, %33 : vector<60x8xf32>
    %c3 = arith.constant 3 : index
    %c0_28 = arith.constant 0 : index
    %c0_29 = arith.constant 0 : index
    %35 = vector.load %arg4[%c3, %c0_28, %c0_29] : memref<5x60x60xf32, #tpu.memory_space<vmem>>, vector<1x60x60xf32>
    %36 = vector.shape_cast %35 : vector<1x60x60xf32> to vector<60x60xf32>
    %cst_30 = arith.constant dense<0.000000e+00> : vector<60x8xf32>
    %37 = tpu.matmul %36, %34, %cst_30 {dimension_numbers = #tpu.dot_dimension_numbers<[1], [0], [0], [1], [0, 0, 1, 1], [], []>} : vector<60x60xf32>, vector<60x8xf32>, vector<60x8xf32> -> vector<60x8xf32>
    %c3_31 = arith.constant 3 : index
    %c0_32 = arith.constant 0 : index
    %c0_33 = arith.constant 0 : index
    %38 = vector.load %arg5[%c3_31, %c0_32, %c0_33] : memref<5x60x1xf32, #tpu.memory_space<vmem>>, vector<1x60x1xf32>
    %39 = vector.shape_cast %38 : vector<1x60x1xf32> to vector<60x1xf32>
    %40 = vector.broadcast %39 : vector<60x1xf32> to vector<60x8xf32>
    %41 = arith.addf %37, %40 : vector<60x8xf32>
    %cst_34 = arith.constant 0.000000e+00 : f32
    %42 = vector.broadcast %cst_34 : f32 to vector<60x8xf32>
    %43 = arith.maximumf %41, %42 : vector<60x8xf32>
    %c4 = arith.constant 4 : index
    %c0_35 = arith.constant 0 : index
    %c0_36 = arith.constant 0 : index
    %44 = vector.load %arg4[%c4, %c0_35, %c0_36] : memref<5x60x60xf32, #tpu.memory_space<vmem>>, vector<1x60x60xf32>
    %45 = vector.shape_cast %44 : vector<1x60x60xf32> to vector<60x60xf32>
    %cst_37 = arith.constant dense<0.000000e+00> : vector<60x8xf32>
    %46 = tpu.matmul %45, %43, %cst_37 {dimension_numbers = #tpu.dot_dimension_numbers<[1], [0], [0], [1], [0, 0, 1, 1], [], []>} : vector<60x60xf32>, vector<60x8xf32>, vector<60x8xf32> -> vector<60x8xf32>
    %c4_38 = arith.constant 4 : index
    %c0_39 = arith.constant 0 : index
    %c0_40 = arith.constant 0 : index
    %47 = vector.load %arg5[%c4_38, %c0_39, %c0_40] : memref<5x60x1xf32, #tpu.memory_space<vmem>>, vector<1x60x1xf32>
    %48 = vector.shape_cast %47 : vector<1x60x1xf32> to vector<60x1xf32>
    %49 = vector.broadcast %48 : vector<60x1xf32> to vector<60x8xf32>
    %50 = arith.addf %46, %49 : vector<60x8xf32>
    %cst_41 = arith.constant 0.000000e+00 : f32
    %51 = vector.broadcast %cst_41 : f32 to vector<60x8xf32>
    %52 = arith.maximumf %50, %51 : vector<60x8xf32>
    %c0_42 = arith.constant 0 : index
    %c0_43 = arith.constant 0 : index
    %53 = vector.load %arg6[%c0_42, %c0_43] : memref<2x60xf32, #tpu.memory_space<vmem>>, vector<2x60xf32>
    %cst_44 = arith.constant dense<0.000000e+00> : vector<2x8xf32>
    %54 = tpu.matmul %53, %52, %cst_44 {dimension_numbers = #tpu.dot_dimension_numbers<[1], [0], [0], [1], [0, 0, 1, 1], [], []>} : vector<2x60xf32>, vector<60x8xf32>, vector<2x8xf32> -> vector<2x8xf32>
    %c0_45 = arith.constant 0 : index
    %c0_46 = arith.constant 0 : index
    %55 = vector.load %arg7[%c0_45, %c0_46] : memref<2x1xf32, #tpu.memory_space<vmem>>, vector<2x1xf32>
    %56 = vector.broadcast %55 : vector<2x1xf32> to vector<2x8xf32>
    %57 = arith.addf %54, %56 : vector<2x8xf32>
    %58 = vector.extract_strided_slice %57 {offsets = [1, 0], sizes = [1, 8], strides = [1, 1]} : vector<2x8xf32> to vector<1x8xf32>
    %59 = vector.extract_strided_slice %57 {offsets = [0, 0], sizes = [1, 8], strides = [1, 1]} : vector<2x8xf32> to vector<1x8xf32>
    %60 = arith.subf %58, %59 : vector<1x8xf32>
    %cst_47 = arith.constant 0.000000e+00 : f32
    %61 = vector.broadcast %cst_47 : f32 to vector<1x8xf32>
    %62 = arith.subf %61, %60 : vector<1x8xf32>
    %63 = math.exp %62 : vector<1x8xf32>
    %cst_48 = arith.constant 1.000000e+00 : f32
    %64 = vector.broadcast %cst_48 : f32 to vector<1x8xf32>
    %65 = arith.addf %64, %63 : vector<1x8xf32>
    %cst_49 = arith.constant 1.000000e+00 : f32
    %66 = vector.broadcast %cst_49 : f32 to vector<1x8xf32>
    %67 = arith.divf %66, %65 : vector<1x8xf32>
    %cst_50 = arith.constant 1.000000e+00 : f32
    %68 = vector.broadcast %cst_50 : f32 to vector<1x8xf32>
    %69 = arith.subf %68, %67 : vector<1x8xf32>
    %70 = tpu.concatenate %69, %67 in 0 : vector<1x8xf32>, vector<1x8xf32> -> vector<2x8xf32>
    %c0_51 = arith.constant 0 : index
    %c0_52 = arith.constant 0 : index
    %71 = vector.load %arg8[%c0_51, %c0_52] : memref<2x8xf32, #tpu.memory_space<vmem>>, vector<2x8xf32>
    tpu.vector_store %arg8[%c0_51, %c0_52], %70 {strides = array<i32>} : memref<2x8xf32, #tpu.memory_space<vmem>>, vector<2x8xf32>,
    return
  }
  func.func @transform_0(%arg0: i32) -> (i32, i32) {
    %c0_i32 = arith.constant 0 : i32
    %c0_i32_0 = arith.constant 0 : i32
    return %c0_i32, %arg0 : i32, i32
  }
  func.func @transform_1(%arg0: i32) -> (i32, i32) {
    %c0_i32 = arith.constant 0 : i32
    %c0_i32_0 = arith.constant 0 : i32
    %c0_i32_1 = arith.constant 0 : i32
    return %c0_i32, %c0_i32_0 : i32, i32
  }
  func.func @transform_2(%arg0: i32) -> (i32, i32) {
    %c0_i32 = arith.constant 0 : i32
    %c0_i32_0 = arith.constant 0 : i32
    %c0_i32_1 = arith.constant 0 : i32
    return %c0_i32, %c0_i32_0 : i32, i32
  }
  func.func @transform_3(%arg0: i32) -> (i32, i32, i32) {
    %c0_i32 = arith.constant 0 : i32
    %c0_i32_0 = arith.constant 0 : i32
    %c0_i32_1 = arith.constant 0 : i32
    %c0_i32_2 = arith.constant 0 : i32
    return %c0_i32, %c0_i32_0, %c0_i32_1 : i32, i32, i32
  }
  func.func @transform_4(%arg0: i32) -> (i32, i32, i32) {
    %c0_i32 = arith.constant 0 : i32
    %c0_i32_0 = arith.constant 0 : i32
    %c0_i32_1 = arith.constant 0 : i32
    %c0_i32_2 = arith.constant 0 : i32
    return %c0_i32, %c0_i32_0, %c0_i32_1 : i32, i32, i32
  }
  func.func @transform_5(%arg0: i32) -> (i32, i32) {
    %c0_i32 = arith.constant 0 : i32
    %c0_i32_0 = arith.constant 0 : i32
    %c0_i32_1 = arith.constant 0 : i32
    return %c0_i32, %c0_i32_0 : i32, i32
  }
  func.func @transform_6(%arg0: i32) -> (i32, i32) {
    %c0_i32 = arith.constant 0 : i32
    %c0_i32_0 = arith.constant 0 : i32
    %c0_i32_1 = arith.constant 0 : i32
    return %c0_i32, %c0_i32_0 : i32, i32
  }
  func.func @transform_7(%arg0: i32) -> (i32, i32) {
    %c0_i32 = arith.constant 0 : i32
    %c0_i32_0 = arith.constant 0 : i32
    return %c0_i32, %arg0 : i32, i32
  }
}

</mosaic_0001>

<bundles_post_ra>
// kernel: tpu_custom_call.1
= control target key start
LH: loop header
LB: loop body
LE: loop exit
PB: predicated region body
PF: predicated region fallthrough
CT: control target
= control target key end

     0   :  { %vm110_vm0 = vcmask 1040384   ;;  %v1077_v2 = vmov 0   ;;  %vm85_vm1 = vcmask 72704   ;;  %s1481_s0 = inlined_call_operand.vmem [shape: f32[9,8], index: 0, kind: input, shape index: {}]   ;;  %s1482_s1 = inlined_call_operand.vmem [shape: f32[60,9], index: 1, kind: input, shape index: {}]   ;;  %s1483_s2 = inlined_call_operand.vmem [shape: f32[60,1], index: 2, kind: input, shape index: {}]   ;;  %s1484_s3 = inlined_call_operand.vmem [shape: f32[5,60,60], index: 3, kind: input, shape index: {}]   ;;  %s1485_s4 = inlined_call_operand.vmem [shape: f32[5,60,1], index: 4, kind: input, shape index: {}]   ;;  %s1486_s5 = inlined_call_operand.vmem [shape: f32[2,60], index: 5, kind: input, shape index: {}]   ;;  %s1487_s6 = inlined_call_operand.vmem [shape: f32[2,1], index: 6, kind: input, shape index: {}]   ;;  %s1488_s7 = inlined_call_operand.hbm [shape: f32[2,8], index: 7, kind: output, shape index: {}]  }
   0x1   :  { %v36_v0 = vld [vmem:[%s1481_s0 + $0x8] sm:$0x1]  ;;  %v44_v1 = vld [vmem:[%s1483_s2 + $0x38] sm:$0xf]  ;;  %1046 = vset.pattern.permute.xlu2 %v1077_v2  ;;  %1045 = vset.pattern.permute.xlu1 %v1077_v2  ;;  %v35_v5 = vld [vmem:[%s1481_s0] sm:$0xff] }
   0x2   :  { %v42_v3 = vld [vmem:[%s1483_s2 + $0x28] sm:$0xff]  ;;  %v40_v4 = vld [vmem:[%s1483_s2 + $0x18] sm:$0xff]  ;;  %1044 = vset.pattern.permute.xlu0 %v1077_v2  ;;  %912 = vmatpush.msk.msra.mxu0 %vm110_vm0, %v36_v0  ;;  %v27_v6 = vld [vmem:[%s1482_s1] sm:$0xff] }
   0x3   :  { %1032 = vmatpush.msk.msra.mxu2 %vm110_vm0, %v36_v0  ;;  %82 = vperm.xlu0 %1044, %v44_v1   ;;  %v32_v7 = vld [vmem:[%s1482_s1 + $0x28] sm:$0xff]  ;;  %v43_v8 = vld [vmem:[%s1483_s2 + $0x30] sm:$0xff]  ;;  %v41_v9 = vld [vmem:[%s1483_s2 + $0x20] sm:$0xff] }
   0x4   :  { %72 = vperm.xlu1 %1045, %v42_v3   ;;  %62 = vperm.xlu2 %1046, %v40_v4   ;;  %v39_v10 = vld [vmem:[%s1483_s2 + $0x10] sm:$0xff] }
   0x5   :  { %129 = vmatpush.msra.mxu0 %v35_v5  ;;  %1033 = vmatpush.msra.mxu2 %v35_v5 }
   0x6   :  { %913 = vmatmul.msk.f32.vlgmr.msra.gmra.mxu0 %vm85_vm1, %v27_v6  ;;  %918 = vmatmul.msk.f32.vlgmr.msra.gmra.mxu2 %vm85_vm1, %v32_v7 }
   0x7   :  { %12 = vsyncpa [#allocation3], 0  ;;  %v28_v11 = vld [vmem:[%s1482_s1 + $0x8] sm:$0xff]  ;;  %v33_v12 = vld [vmem:[%s1482_s1 + $0x30] sm:$0xff]  ;;  %vm244_vm2 = vcmask 1043456   ;;  %vm219_vm3 = vcmask 490496  }
   0x8   :  { %v38_v13 = vld [vmem:[%s1483_s2 + $0x8] sm:$0xff]  ;;  %v178_v14 = vld [vmem:[%s1485_s4 + $0x38] sm:$0xf]  ;;  %v37_v15 = vld [vmem:[%s1483_s2] sm:$0xff]  ;;  %vm894_vm8 = vcmask 58368  }
   0x9   :  { %v29_v16 = vld [vmem:[%s1482_s1 + $0x10] sm:$0xff]  ;;  %v34_v17 = vld [vmem:[%s1482_s1 + $0x38] sm:$0xf]  ;;  %v175_v19 = vld [vmem:[%s1485_s4 + $0x20] sm:$0xff] }
   0xa   :  { %v177_v18 = vld [vmem:[%s1485_s4 + $0x30] sm:$0xff]  ;;  %v176_v20 = vld [vmem:[%s1485_s4 + $0x28] sm:$0xff]  ;;  %v30_v21 = vld [vmem:[%s1482_s1 + $0x18] sm:$0xff] }
   0xb   :  { %77 = vperm.xlu0 %1044, %v43_v8   ;;  %v174_v22 = vld [vmem:[%s1485_s4 + $0x18] sm:$0xff]  ;;  %v172_v23 = vld [vmem:[%s1485_s4 + $0x8] sm:$0xff]  ;;  %v173_v24 = vld [vmem:[%s1485_s4 + $0x10] sm:$0xff] }
   0xc   :  { %67 = vperm.xlu1 %1045, %v41_v9   ;;  %57 = vperm.xlu2 %1046, %v39_v10   ;;  %v31_v25 = vld [vmem:[%s1482_s1 + $0x20] sm:$0xff]  ;;  %v944_v27 = vld [vmem:[%s1485_s4 + $0x70] sm:$0xff]  ;;  %v945_v28 = vld [vmem:[%s1485_s4 + $0x78] sm:$0xf] }
   0xd   :  { %v171_v26 = vld [vmem:[%s1485_s4] sm:$0xff]  ;;  %v943_v29 = vld [vmem:[%s1485_s4 + $0x68] sm:$0xff]  ;;  %v941_v30 = vld [vmem:[%s1485_s4 + $0x58] sm:$0xff] }
   0xe   :  { %914 = vmatmul.msk.f32.gmra.mxu0 %vm85_vm1, %v28_v11  ;;  %919 = vmatmul.msk.f32.gmra.mxu2 %vm85_vm1, %v33_v12  ;;  %v942_v31 = vld [vmem:[%s1485_s4 + $0x60] sm:$0xff]  ;;  %v940_v32 = vld [vmem:[%s1485_s4 + $0x50] sm:$0xff]  ;;  %v939_v34 = vld [vmem:[%s1485_s4 + $0x48] sm:$0xff] }
   0xf   :  { %v938_v33 = vld [vmem:[%s1485_s4 + $0x40] sm:$0xff]  ;;  %v970_v35 = vld [vmem:[%s1485_s4 + $0xb8] sm:$0xf]  ;;  %v968_v36 = vld [vmem:[%s1485_s4 + $0xa8] sm:$0xff] }
  0x10   :  { %v969_v37 = vld [vmem:[%s1485_s4 + $0xb0] sm:$0xff]  ;;  %v967_v38 = vld [vmem:[%s1485_s4 + $0xa0] sm:$0xff]  ;;  %v966_v40 = vld [vmem:[%s1485_s4 + $0x98] sm:$0xff] }
  0x11   :  { %v965_v39 = vld [vmem:[%s1485_s4 + $0x90] sm:$0xff]  ;;  %v964_v41 = vld [vmem:[%s1485_s4 + $0x88] sm:$0xff]  ;;  %v995_v42 = vld [vmem:[%s1485_s4 + $0xf8] sm:$0xf] }
  0x12   :  { %v963_v43 = vld [vmem:[%s1485_s4 + $0x80] sm:$0xff]  ;;  %v994_v44 = vld [vmem:[%s1485_s4 + $0xf0] sm:$0xff]  ;;  %v993_v46 = vld [vmem:[%s1485_s4 + $0xe8] sm:$0xff] }
  0x13   :  { %52 = vperm.xlu0 %1044, %v38_v13   ;;  %v992_v45 = vld [vmem:[%s1485_s4 + $0xe0] sm:$0xff]  ;;  %v991_v47 = vld [vmem:[%s1485_s4 + $0xd8] sm:$0xff]  ;;  %v989_v48 = vld [vmem:[%s1485_s4 + $0xc8] sm:$0xff] }
  0x14   :  { %216 = vperm.xlu2 %1046, %v178_v14   ;;  %47 = vperm.xlu1 %1045, %v37_v15   ;;  %v990_v49 = vld [vmem:[%s1485_s4 + $0xd0] sm:$0xff]  ;;  %v988_v50 = vld [vmem:[%s1485_s4 + $0xc0] sm:$0xff]  ;;  %v1020_v52 = vld [vmem:[%s1485_s4 + $0x138] sm:$0xf] }
  0x15   :  { %v1019_v51 = vld [vmem:[%s1485_s4 + $0x130] sm:$0xff]  ;;  %v1018_v53 = vld [vmem:[%s1485_s4 + $0x128] sm:$0xff]  ;;  %v1016_v54 = vld [vmem:[%s1485_s4 + $0x118] sm:$0xff] }
  0x16   :  { %915 = vmatmul.msk.f32.gmra.mxu0 %vm85_vm1, %v29_v16  ;;  %920 = vmatmul.msk.f32.gmra.mxu2 %vm85_vm1, %v34_v17  ;;  %v1017_v55 = vld [vmem:[%s1485_s4 + $0x120] sm:$0xff]  ;;  %v1015_v56 = vld [vmem:[%s1485_s4 + $0x110] sm:$0xff]  ;;  %v1014_v58 = vld [vmem:[%s1485_s4 + $0x108] sm:$0xff] }
  0x17   :  { %v1013_v57 = vld [vmem:[%s1485_s4 + $0x100] sm:$0xff]  ;;  %s903_s4 = sshll.u32 %s1488_s7, 4  ;;  %s904_s4 = int_to_ptr.hbm [resolvable:$true] %s903_s4 }
  0x18   :  { %v834_v59 = vld [vmem:[%s1487_s6] sm:$0x3] }
  0x1b   :  { %211 = vperm.xlu0 %1044, %v177_v18  }
  0x1c   :  { %201 = vperm.xlu2 %1046, %v175_v19   ;;  %206 = vperm.xlu1 %1045, %v176_v20  }
  0x1e   :  { %916 = vmatmul.msk.f32.gmra.mxu0 %vm85_vm1, %v30_v21 }
  0x23   :  { %196 = vperm.xlu0 %1044, %v174_v22  }
  0x24   :  { %186 = vperm.xlu2 %1046, %v172_v23   ;;  %191 = vperm.xlu1 %1045, %v173_v24  }
  0x26   :  { %917 = vmatmul.msk.f32.gmra.mxu0 %vm85_vm1, %v31_v25 }
  0x2b   :  { %181 = vperm.xlu0 %1044, %v171_v26  }
  0x2c   :  { %347 = vperm.xlu2 %1046, %v944_v27   ;;  %352 = vperm.xlu1 %1045, %v945_v28   ;;  %v163_v28 = vld [vmem:[%s1484_s3] sm:$0xff] }
  0x33   :  { %342 = vperm.xlu0 %1044, %v943_v29   ;;  %v167_v29 = vld [vmem:[%s1484_s3 + $0x20] sm:$0xff] }
  0x34   :  { %332 = vperm.xlu2 %1046, %v941_v30   ;;  %337 = vperm.xlu1 %1045, %v942_v31   ;;  %v164_v30 = vld [vmem:[%s1484_s3 + $0x8] sm:$0xff] }
  0x35   :  { %v168_v31 = vld [vmem:[%s1484_s3 + $0x28] sm:$0xff] }
  0x3b   :  { %327 = vperm.xlu0 %1044, %v940_v32   ;;  %v165_v32 = vld [vmem:[%s1484_s3 + $0x10] sm:$0xff] }
  0x3c   :  { %317 = vperm.xlu2 %1046, %v938_v33   ;;  %322 = vperm.xlu1 %1045, %v939_v34   ;;  %v169_v33 = vld [vmem:[%s1484_s3 + $0x30] sm:$0xff]  ;;  %v166_v34 = vld [vmem:[%s1484_s3 + $0x18] sm:$0xff] }
  0x43   :  { %486 = vperm.xlu0 %1044, %v970_v35   ;;  %v170_v35 = vld [vmem:[%s1484_s3 + $0x38] sm:$0xf] }
  0x44   :  { %476 = vperm.xlu2 %1046, %v968_v36   ;;  %481 = vperm.xlu1 %1045, %v969_v37  }
  0x4b   :  { %471 = vperm.xlu0 %1044, %v967_v38  }
  0x4c   :  { %461 = vperm.xlu2 %1046, %v965_v39   ;;  %466 = vperm.xlu1 %1045, %v966_v40  }
  0x53   :  { %456 = vperm.xlu0 %1044, %v964_v41  }
  0x54   :  { %620 = vperm.xlu2 %1046, %v995_v42   ;;  %451 = vperm.xlu1 %1045, %v963_v43  }
  0x5b   :  { %615 = vperm.xlu0 %1044, %v994_v44  }
  0x5c   :  { %605 = vperm.xlu2 %1046, %v992_v45   ;;  %610 = vperm.xlu1 %1045, %v993_v46  }
  0x5e   :  { %v63_v7 = vpop.permute.xlu2 %62 }
  0x63   :  { %600 = vperm.xlu0 %1044, %v991_v47  }
  0x64   :  { %590 = vperm.xlu2 %1046, %v989_v48   ;;  %595 = vperm.xlu1 %1045, %v990_v49  }
  0x66   :  { %v58_v17 = vpop.permute.xlu2 %57 }
  0x6b   :  { %585 = vperm.xlu0 %1044, %v988_v50  }
  0x6c   :  { %749 = vperm.xlu2 %1046, %v1019_v51   ;;  %754 = vperm.xlu1 %1045, %v1020_v52  }
  0x6e   :  { %v217_v40 = vpop.permute.xlu2 %216 }
  0x73   :  { %744 = vperm.xlu0 %1044, %v1018_v53  }
  0x74   :  { %734 = vperm.xlu2 %1046, %v1016_v54   ;;  %739 = vperm.xlu1 %1045, %v1017_v55  }
  0x75   :  { %v83_v63 = vpop.permute.xlu0 %82 }
  0x76   :  { %v73_v1 = vpop.permute.xlu1 %72  ;;  %v202_v45 = vpop.permute.xlu2 %201 }
  0x7b   :  { %729 = vperm.xlu0 %1044, %v1015_v56  }
  0x7c   :  { %719 = vperm.xlu2 %1046, %v1013_v57   ;;  %724 = vperm.xlu1 %1045, %v1014_v58  }
  0x7d   :  { %v78_v3 = vpop.permute.xlu0 %77 }
  0x7e   :  { %v68_v11 = vpop.permute.xlu1 %67 }
  0x83   :  { %v131_v60 = vpop.f32.mrf.mxu0  ;;  %837 = vperm.xlu0 %1044, %v834_v59  }
  0x85   :  { %v53_v20 = vpop.permute.xlu0 %52 }
  0x86   :  { %v48_v21 = vpop.permute.xlu1 %47 }
  0x87   :  { %v132_v24 = vadd.f32 %v131_v60, %v48_v21  ;;  %v187_v60 = vpop.permute.xlu2 %186 }
  0x89   :  { %v146_v61 = vpop.f32.mrf.mxu2  ;;  %v155_v27 = vmax.f32 %v132_v24, 0.0 }
  0x8a   :  { %v147_v9 = vadd.f32 %v146_v61, %v73_v1 }
  0x8b   :  { %v134_v62 = vpop.f32.mrf.mxu0 }
  0x8c   :  { %v160_v13 = vmax.f32 %v147_v9, 0.0  ;;  %v135_v22 = vadd.f32 %v134_v62, %v53_v20  ;;  %v935_v9 = vld [vmem:[%s1484_s3 + $0x68] sm:$0xff] }
  0x8d   :  { %v212_v41 = vpop.permute.xlu0 %211 }
  0x8e   :  { %v156_v26 = vmax.f32 %v135_v22, 0.0  ;;  %v207_v44 = vpop.permute.xlu1 %206 }
  0x91   :  { %v149_v0 = vpop.f32.mrf.mxu2 }
  0x92   :  { %v150_v5 = vadd.f32 %v149_v0, %v78_v3 }
  0x93   :  { %v137_v2 = vpop.f32.mrf.mxu0 }
  0x94   :  { %v161_v12 = vmax.f32 %v150_v5, 0.0  ;;  %v138_v18 = vadd.f32 %v137_v2, %v58_v17  ;;  %v931_v5 = vld [vmem:[%s1484_s3 + $0x48] sm:$0xff] }
  0x95   :  { %v197_v49 = vpop.permute.xlu0 %196 }
  0x96   :  { %v157_v25 = vmax.f32 %v138_v18, 0.0  ;;  %v192_v57 = vpop.permute.xlu1 %191 }
  0x99   :  { %v152_v4 = vpop.f32.mrf.mxu2 }
  0x9a   :  { %v153_v6 = vadd.f32 %v152_v4, %v83_v63  ;;  %v930_v4 = vld [vmem:[%s1484_s3 + $0x40] sm:$0xff] }
  0x9b   :  { %v140_v8 = vpop.f32.mrf.mxu0 }
  0x9c   :  { %v162_v10 = vmax.f32 %v153_v6, 0.0  ;;  %v141_v15 = vadd.f32 %v140_v8, %v63_v7  ;;  %v932_v6 = vld [vmem:[%s1484_s3 + $0x50] sm:$0xff]  ;;  %v933_v7 = vld [vmem:[%s1484_s3 + $0x58] sm:$0xff]  ;;  %v934_v8 = vld [vmem:[%s1484_s3 + $0x60] sm:$0xff] }
  0x9d   :  { %v182_v63 = vpop.permute.xlu0 %181 }
  0x9e   :  { %921 = vmatpush.msk.msra.mxu1 %vm244_vm2, %v162_v10  ;;  %1034 = vmatpush.msk.msra.mxu3 %vm244_vm2, %v162_v10  ;;  %v158_v23 = vmax.f32 %v141_v15, 0.0  ;;  %v936_v10 = vld [vmem:[%s1484_s3 + $0x70] sm:$0xff]  ;;  %v353_v18 = vpop.permute.xlu1 %352 }
  0xa0   :  { %257 = vmatpush.msra.mxu1 %v161_v12  ;;  %1035 = vmatpush.msra.mxu3 %v161_v12 }
  0xa2   :  { %258 = vmatpush.msra.mxu1 %v160_v13  ;;  %1036 = vmatpush.msra.mxu3 %v160_v13 }
  0xa3   :  { %v143_v14 = vpop.f32.mrf.mxu0 }
  0xa4   :  { %v144_v16 = vadd.f32 %v143_v14, %v68_v11  ;;  %v937_v11 = vld [vmem:[%s1484_s3 + $0x78] sm:$0xf] }
  0xa5   :  { %v343_v21 = vpop.permute.xlu0 %342 }
  0xa6   :  { %v159_v19 = vmax.f32 %v144_v16, 0.0  ;;  %v338_v22 = vpop.permute.xlu1 %337 }
  0xa8   :  { %259 = vmatpush.msra.mxu1 %v159_v19  ;;  %1037 = vmatpush.msra.mxu3 %v159_v19  ;;  %v348_v19 = vpop.permute.xlu2 %347 }
  0xaa   :  { %260 = vmatpush.msra.mxu1 %v158_v23  ;;  %1038 = vmatpush.msra.mxu3 %v158_v23 }
  0xac   :  { %261 = vmatpush.msra.mxu1 %v157_v25  ;;  %1039 = vmatpush.msra.mxu3 %v157_v25 }
  0xae   :  { %262 = vmatpush.msra.mxu1 %v156_v26  ;;  %1040 = vmatpush.msra.mxu3 %v156_v26 }
  0xb0   :  { %263 = vmatpush.msra.mxu1 %v155_v27  ;;  %1041 = vmatpush.msra.mxu3 %v155_v27  ;;  %v333_v26 = vpop.permute.xlu2 %332 }
  0xb1   :  { %922 = vmatmul.msk.f32.vlgmr.msra.gmra.mxu1 %vm219_vm3, %v163_v28  ;;  %926 = vmatmul.msk.f32.vlgmr.msra.gmra.mxu3 %vm219_vm3, %v167_v29 }
  0xb9   :  { %923 = vmatmul.msk.f32.gmra.mxu1 %vm219_vm3, %v164_v30  ;;  %927 = vmatmul.msk.f32.gmra.mxu3 %vm219_vm3, %v168_v31 }
  0xc1   :  { %924 = vmatmul.msk.f32.gmra.mxu1 %vm219_vm3, %v165_v32  ;;  %928 = vmatmul.msk.f32.gmra.mxu3 %vm219_vm3, %v169_v33  ;;  %v328_v33 = vpop.permute.xlu0 %327 }
  0xc9   :  { %925 = vmatmul.msk.f32.gmra.mxu1 %vm219_vm3, %v166_v34  ;;  %929 = vmatmul.msk.f32.gmra.mxu3 %vm219_vm3, %v170_v35 }
 0x12e   :  { %v265_v36 = vpop.f32.mrf.mxu1 }
 0x12f   :  { %v266_v0 = vadd.f32 %v265_v36, %v182_v63  ;;  %v323_v36 = vpop.permute.xlu1 %322 }
 0x131   :  { %v289_v3 = vmax.f32 %v266_v0, 0.0 }
 0x134   :  { %v277_v37 = vpop.f32.mrf.mxu3 }
 0x135   :  { %v278_v53 = vadd.f32 %v277_v37, %v202_v45  ;;  %v956_v45 = vld [vmem:[%s1484_s3 + $0x88] sm:$0xff] }
 0x136   :  { %v268_v38 = vpop.f32.mrf.mxu1 }
 0x137   :  { %v293_v58 = vmax.f32 %v278_v53, 0.0  ;;  %v269_v61 = vadd.f32 %v268_v38, %v187_v60 }
 0x139   :  { %v290_v2 = vmax.f32 %v269_v61, 0.0 }
 0x13c   :  { %v280_v39 = vpop.f32.mrf.mxu3 }
 0x13d   :  { %v281_v50 = vadd.f32 %v280_v39, %v207_v44  ;;  %v318_v39 = vpop.permute.xlu2 %317  ;;  %v955_v44 = vld [vmem:[%s1484_s3 + $0x80] sm:$0xff] }
 0x13e   :  { %v271_v43 = vpop.f32.mrf.mxu1 }
 0x13f   :  { %v294_v55 = vmax.f32 %v281_v50, 0.0  ;;  %v272_v59 = vadd.f32 %v271_v43, %v192_v57  ;;  %v961_v50 = vld [vmem:[%s1484_s3 + $0xb0] sm:$0xff] }
 0x141   :  { %v291_v1 = vmax.f32 %v272_v59, 0.0  ;;  %v482_v59 = vpop.permute.xlu1 %481 }
 0x144   :  { %v283_v42 = vpop.f32.mrf.mxu3 }
 0x145   :  { %v284_v47 = vadd.f32 %v283_v42, %v212_v41  ;;  %v477_v61 = vpop.permute.xlu2 %476 }
 0x146   :  { %v274_v52 = vpop.f32.mrf.mxu1 }
 0x147   :  { %v295_v54 = vmax.f32 %v284_v47, 0.0  ;;  %v275_v56 = vadd.f32 %v274_v52, %v197_v49  ;;  %v958_v47 = vld [vmem:[%s1484_s3 + $0x98] sm:$0xff]  ;;  %v960_v49 = vld [vmem:[%s1484_s3 + $0xa8] sm:$0xff] }
 0x149   :  { %v292_v62 = vmax.f32 %v275_v56, 0.0 }
 0x14c   :  { %v286_v46 = vpop.f32.mrf.mxu3 }
 0x14d   :  { %v287_v48 = vadd.f32 %v286_v46, %v217_v40  ;;  %v957_v46 = vld [vmem:[%s1484_s3 + $0x90] sm:$0xff] }
 0x14f   :  { %v296_v51 = vmax.f32 %v287_v48, 0.0  ;;  %v959_v48 = vld [vmem:[%s1484_s3 + $0xa0] sm:$0xff] }
 0x151   :  { %946 = vmatpush.msk.msrb.mxu2 %vm244_vm2, %v296_v51  ;;  %v962_v51 = vld [vmem:[%s1484_s3 + $0xb8] sm:$0xf] }
 0x153   :  { %391 = vmatpush.msrb.mxu2 %v295_v54 }
 0x155   :  { %392 = vmatpush.msrb.mxu2 %v294_v55 }
 0x157   :  { %393 = vmatpush.msrb.mxu2 %v293_v58  ;;  %v487_v58 = vpop.permute.xlu0 %486 }
 0x159   :  { %394 = vmatpush.msrb.mxu2 %v292_v62 }
 0x15b   :  { %395 = vmatpush.msrb.mxu2 %v291_v1 }
 0x15d   :  { %396 = vmatpush.msrb.mxu2 %v290_v2  ;;  %v467_v2 = vpop.permute.xlu1 %466 }
 0x15f   :  { %397 = vmatpush.msrb.mxu2 %v289_v3  ;;  %v472_v62 = vpop.permute.xlu0 %471 }
 0x160   :  { %947 = vmatmul.msk.f32.vlgmr.msrb.gmra.mxu2 %vm219_vm3, %v930_v4 }
 0x168   :  { %948 = vmatmul.msk.f32.gmra.mxu2 %vm219_vm3, %v931_v5 }
 0x170   :  { %949 = vmatmul.msk.f32.gmra.mxu2 %vm219_vm3, %v932_v6 }
 0x178   :  { %950 = vmatmul.msk.f32.gmra.mxu2 %vm219_vm3, %v933_v7 }
 0x180   :  { %951 = vmatmul.msk.f32.gmra.mxu2 %vm219_vm3, %v934_v8 }
 0x188   :  { %952 = vmatmul.msk.f32.gmra.mxu2 %vm219_vm3, %v935_v9  ;;  %v462_v9 = vpop.permute.xlu2 %461 }
 0x190   :  { %953 = vmatmul.msk.f32.gmra.mxu2 %vm219_vm3, %v936_v10 }
 0x198   :  { %954 = vmatmul.msk.f32.gmra.mxu2 %vm219_vm3, %v937_v11 }
 0x1e3   :  { %v399_v12 = vpop.f32.mrf.mxu2 }
 0x1e4   :  { %v400_v40 = vadd.f32 %v399_v12, %v318_v39  ;;  %v457_v12 = vpop.permute.xlu0 %456 }
 0x1e6   :  { %v423_v43 = vmax.f32 %v400_v40, 0.0 }
 0x1eb   :  { %v402_v13 = vpop.f32.mrf.mxu2 }
 0x1ec   :  { %v403_v37 = vadd.f32 %v402_v13, %v323_v36 }
 0x1ee   :  { %v424_v42 = vmax.f32 %v403_v37, 0.0 }
 0x1f3   :  { %v405_v14 = vpop.f32.mrf.mxu2 }
 0x1f4   :  { %v406_v34 = vadd.f32 %v405_v14, %v328_v33 }
 0x1f6   :  { %v425_v41 = vmax.f32 %v406_v34, 0.0  ;;  %v621_v34 = vpop.permute.xlu2 %620 }
 0x1fb   :  { %v408_v15 = vpop.f32.mrf.mxu2 }
 0x1fc   :  { %v409_v31 = vadd.f32 %v408_v15, %v333_v26  ;;  %v452_v15 = vpop.permute.xlu1 %451  ;;  %v986_v26 = vld [vmem:[%s1484_s3 + $0xf0] sm:$0xff] }
 0x1fe   :  { %v426_v38 = vmax.f32 %v409_v31, 0.0 }
 0x203   :  { %v411_v16 = vpop.f32.mrf.mxu2 }
 0x204   :  { %v412_v29 = vadd.f32 %v411_v16, %v338_v22  ;;  %v982_v22 = vld [vmem:[%s1484_s3 + $0xd0] sm:$0xff]  ;;  %v611_v37 = vpop.permute.xlu1 %610 }
 0x206   :  { %v427_v35 = vmax.f32 %v412_v29, 0.0 }
 0x20b   :  { %v414_v17 = vpop.f32.mrf.mxu2 }
 0x20c   :  { %v415_v27 = vadd.f32 %v414_v17, %v343_v21  ;;  %v981_v21 = vld [vmem:[%s1484_s3 + $0xc8] sm:$0xff] }
 0x20e   :  { %v428_v32 = vmax.f32 %v415_v27, 0.0  ;;  %v987_v27 = vld [vmem:[%s1484_s3 + $0xf8] sm:$0xf] }
 0x213   :  { %v417_v20 = vpop.f32.mrf.mxu2 }
 0x214   :  { %v418_v24 = vadd.f32 %v417_v20, %v348_v19  ;;  %v980_v20 = vld [vmem:[%s1484_s3 + $0xc0] sm:$0xff] }
 0x216   :  { %v429_v30 = vmax.f32 %v418_v24, 0.0  ;;  %v984_v24 = vld [vmem:[%s1484_s3 + $0xe0] sm:$0xff] }
 0x21b   :  { %v420_v23 = vpop.f32.mrf.mxu2 }
 0x21c   :  { %v421_v25 = vadd.f32 %v420_v23, %v353_v18  ;;  %v983_v23 = vld [vmem:[%s1484_s3 + $0xd8] sm:$0xff] }
 0x21e   :  { %v430_v28 = vmax.f32 %v421_v25, 0.0  ;;  %v985_v25 = vld [vmem:[%s1484_s3 + $0xe8] sm:$0xff] }
 0x220   :  { %971 = vmatpush.msk.msrb.mxu3 %vm244_vm2, %v430_v28 }
 0x222   :  { %525 = vmatpush.msrb.mxu3 %v429_v30 }
 0x224   :  { %526 = vmatpush.msrb.mxu3 %v428_v32 }
 0x226   :  { %527 = vmatpush.msrb.mxu3 %v427_v35  ;;  %v616_v35 = vpop.permute.xlu0 %615 }
 0x228   :  { %528 = vmatpush.msrb.mxu3 %v426_v38  ;;  %v606_v38 = vpop.permute.xlu2 %605 }
 0x22a   :  { %529 = vmatpush.msrb.mxu3 %v425_v41 }
 0x22c   :  { %530 = vmatpush.msrb.mxu3 %v424_v42 }
 0x22e   :  { %531 = vmatpush.msrb.mxu3 %v423_v43  ;;  %v601_v42 = vpop.permute.xlu0 %600 }
 0x22f   :  { %972 = vmatmul.msk.f32.vlgmr.msrb.gmra.mxu3 %vm219_vm3, %v955_v44 }
 0x237   :  { %973 = vmatmul.msk.f32.gmra.mxu3 %vm219_vm3, %v956_v45 }
 0x23f   :  { %974 = vmatmul.msk.f32.gmra.mxu3 %vm219_vm3, %v957_v46 }
 0x247   :  { %975 = vmatmul.msk.f32.gmra.mxu3 %vm219_vm3, %v958_v47 }
 0x24f   :  { %976 = vmatmul.msk.f32.gmra.mxu3 %vm219_vm3, %v959_v48 }
 0x257   :  { %977 = vmatmul.msk.f32.gmra.mxu3 %vm219_vm3, %v960_v49  ;;  %v596_v49 = vpop.permute.xlu1 %595 }
 0x25f   :  { %978 = vmatmul.msk.f32.gmra.mxu3 %vm219_vm3, %v961_v50 }
 0x267   :  { %979 = vmatmul.msk.f32.gmra.mxu3 %vm219_vm3, %v962_v51 }
 0x2b2   :  { %v533_v52 = vpop.f32.mrf.mxu3 }
 0x2b3   :  { %v534_v16 = vadd.f32 %v533_v52, %v452_v15  ;;  %v591_v52 = vpop.permute.xlu2 %590 }
 0x2b5   :  { %v557_v19 = vmax.f32 %v534_v16, 0.0 }
 0x2ba   :  { %v536_v53 = vpop.f32.mrf.mxu3 }
 0x2bb   :  { %v537_v13 = vadd.f32 %v536_v53, %v457_v12 }
 0x2bd   :  { %v558_v18 = vmax.f32 %v537_v13, 0.0 }
 0x2c2   :  { %v539_v54 = vpop.f32.mrf.mxu3 }
 0x2c3   :  { %v540_v10 = vadd.f32 %v539_v54, %v462_v9 }
 0x2c5   :  { %v559_v17 = vmax.f32 %v540_v10, 0.0  ;;  %v755_v10 = vpop.permute.xlu1 %754 }
 0x2ca   :  { %v542_v55 = vpop.f32.mrf.mxu3 }
 0x2cb   :  { %v543_v7 = vadd.f32 %v542_v55, %v467_v2  ;;  %v586_v55 = vpop.permute.xlu0 %585  ;;  %v1011_v2 = vld [vmem:[%s1484_s3 + $0x130] sm:$0xff] }
 0x2cd   :  { %v560_v14 = vmax.f32 %v543_v7, 0.0 }
 0x2d2   :  { %v545_v56 = vpop.f32.mrf.mxu3 }
 0x2d3   :  { %v546_v5 = vadd.f32 %v545_v56, %v472_v62  ;;  %v1007_v62 = vld [vmem:[%s1484_s3 + $0x110] sm:$0xff]  ;;  %v745_v13 = vpop.permute.xlu0 %744 }
 0x2d5   :  { %v561_v11 = vmax.f32 %v546_v5, 0.0 }
 0x2da   :  { %v548_v57 = vpop.f32.mrf.mxu3 }
 0x2db   :  { %v549_v3 = vadd.f32 %v548_v57, %v477_v61  ;;  %v1006_v61 = vld [vmem:[%s1484_s3 + $0x108] sm:$0xff] }
 0x2dd   :  { %v562_v8 = vmax.f32 %v549_v3, 0.0  ;;  %v1012_v3 = vld [vmem:[%s1484_s3 + $0x138] sm:$0xf] }
 0x2e2   :  { %v551_v60 = vpop.f32.mrf.mxu3 }
 0x2e3   :  { %v552_v0 = vadd.f32 %v551_v60, %v482_v59  ;;  %v1005_v60 = vld [vmem:[%s1484_s3 + $0x100] sm:$0xff] }
 0x2e5   :  { %v563_v6 = vmax.f32 %v552_v0, 0.0  ;;  %v1009_v0 = vld [vmem:[%s1484_s3 + $0x120] sm:$0xff] }
 0x2ea   :  { %v554_v63 = vpop.f32.mrf.mxu3 }
 0x2eb   :  { %v555_v1 = vadd.f32 %v554_v63, %v487_v58  ;;  %v1008_v63 = vld [vmem:[%s1484_s3 + $0x118] sm:$0xff] }
 0x2ed   :  { %v564_v4 = vmax.f32 %v555_v1, 0.0  ;;  %v1010_v1 = vld [vmem:[%s1484_s3 + $0x128] sm:$0xff] }
 0x2ef   :  { %996 = vmatpush.msk.msrb.mxu0 %vm244_vm2, %v564_v4 }
 0x2f1   :  { %659 = vmatpush.msrb.mxu0 %v563_v6 }
 0x2f3   :  { %660 = vmatpush.msrb.mxu0 %v562_v8 }
 0x2f5   :  { %661 = vmatpush.msrb.mxu0 %v561_v11  ;;  %v750_v11 = vpop.permute.xlu2 %749 }
 0x2f7   :  { %662 = vmatpush.msrb.mxu0 %v560_v14  ;;  %v740_v14 = vpop.permute.xlu1 %739 }
 0x2f9   :  { %663 = vmatpush.msrb.mxu0 %v559_v17 }
 0x2fb   :  { %664 = vmatpush.msrb.mxu0 %v558_v18 }
 0x2fd   :  { %665 = vmatpush.msrb.mxu0 %v557_v19  ;;  %v735_v18 = vpop.permute.xlu2 %734 }
 0x2fe   :  { %997 = vmatmul.msk.f32.vlgmr.msrb.gmra.mxu0 %vm219_vm3, %v980_v20 }
 0x306   :  { %998 = vmatmul.msk.f32.gmra.mxu0 %vm219_vm3, %v981_v21 }
 0x30e   :  { %999 = vmatmul.msk.f32.gmra.mxu0 %vm219_vm3, %v982_v22 }
 0x316   :  { %1000 = vmatmul.msk.f32.gmra.mxu0 %vm219_vm3, %v983_v23 }
 0x31e   :  { %1001 = vmatmul.msk.f32.gmra.mxu0 %vm219_vm3, %v984_v24 }
 0x326   :  { %1002 = vmatmul.msk.f32.gmra.mxu0 %vm219_vm3, %v985_v25  ;;  %v730_v25 = vpop.permute.xlu0 %729 }
 0x32e   :  { %1003 = vmatmul.msk.f32.gmra.mxu0 %vm219_vm3, %v986_v26 }
 0x336   :  { %1004 = vmatmul.msk.f32.gmra.mxu0 %vm219_vm3, %v987_v27 }
 0x37b   :  { %v667_v28 = vpop.f32.mrf.mxu0 }
 0x37c   :  { %v668_v56 = vadd.f32 %v667_v28, %v586_v55  ;;  %v725_v28 = vpop.permute.xlu1 %724 }
 0x37e   :  { %v691_v59 = vmax.f32 %v668_v56, 0.0 }
 0x383   :  { %v670_v29 = vpop.f32.mrf.mxu0 }
 0x384   :  { %v671_v53 = vadd.f32 %v670_v29, %v591_v52 }
 0x386   :  { %v692_v58 = vmax.f32 %v671_v53, 0.0 }
 0x38b   :  { %v673_v30 = vpop.f32.mrf.mxu0 }
 0x38c   :  { %v674_v50 = vadd.f32 %v673_v30, %v596_v49 }
 0x38e   :  { %v693_v57 = vmax.f32 %v674_v50, 0.0 }
 0x393   :  { %v676_v31 = vpop.f32.mrf.mxu0 }
 0x394   :  { %v677_v47 = vadd.f32 %v676_v31, %v601_v42  ;;  %v720_v31 = vpop.permute.xlu2 %719 }
 0x396   :  { %v694_v54 = vmax.f32 %v677_v47, 0.0 }
 0x39b   :  { %v679_v32 = vpop.f32.mrf.mxu0 }
 0x39c   :  { %v680_v45 = vadd.f32 %v679_v32, %v606_v38 }
 0x39e   :  { %v695_v51 = vmax.f32 %v680_v45, 0.0 }
 0x3a3   :  { %v682_v33 = vpop.f32.mrf.mxu0 }
 0x3a4   :  { %v683_v43 = vadd.f32 %v682_v33, %v611_v37  ;;  %v838_v37 = vpop.permute.xlu0 %837 }
 0x3a6   :  { %v696_v48 = vmax.f32 %v683_v43, 0.0 }
 0x3ab   :  { %v685_v36 = vpop.f32.mrf.mxu0 }
 0x3ac   :  { %v686_v40 = vadd.f32 %v685_v36, %v616_v35  ;;  %v833_v36 = vld [vmem:[%s1486_s5] sm:$0x3]  ;;  %s1078_s5 = smov [#allocation2]  }
 0x3ad   :  { %s901_s13 = sshll.u32 %s1078_s5, 4  ;;  %s902_s13 = int_to_ptr.vmem [resolvable:$true] %s901_s13 }
 0x3ae   :  { %v697_v46 = vmax.f32 %v686_v40, 0.0 }
 0x3b3   :  { %v688_v39 = vpop.f32.mrf.mxu0 }
 0x3b4   :  { %v689_v41 = vadd.f32 %v688_v39, %v621_v34 }
 0x3b6   :  { %v698_v44 = vmax.f32 %v689_v41, 0.0 }
 0x3b8   :  { %1021 = vmatpush.msk.msrb.mxu1 %vm244_vm2, %v698_v44 }
 0x3ba   :  { %793 = vmatpush.msrb.mxu1 %v697_v46 }
 0x3bc   :  { %794 = vmatpush.msrb.mxu1 %v696_v48 }
 0x3be   :  { %795 = vmatpush.msrb.mxu1 %v695_v51 }
 0x3c0   :  { %796 = vmatpush.msrb.mxu1 %v694_v54 }
 0x3c2   :  { %797 = vmatpush.msrb.mxu1 %v693_v57 }
 0x3c4   :  { %798 = vmatpush.msrb.mxu1 %v692_v58 }
 0x3c6   :  { %799 = vmatpush.msrb.mxu1 %v691_v59 }
 0x3c7   :  { %1022 = vmatmul.msk.f32.vlgmr.msrb.gmra.mxu1 %vm219_vm3, %v1005_v60 }
 0x3cf   :  { %1023 = vmatmul.msk.f32.gmra.mxu1 %vm219_vm3, %v1006_v61 }
 0x3d7   :  { %1024 = vmatmul.msk.f32.gmra.mxu1 %vm219_vm3, %v1007_v62 }
 0x3df   :  { %1025 = vmatmul.msk.f32.gmra.mxu1 %vm219_vm3, %v1008_v63 }
 0x3e7   :  { %1026 = vmatmul.msk.f32.gmra.mxu1 %vm219_vm3, %v1009_v0 }
 0x3ef   :  { %1027 = vmatmul.msk.f32.gmra.mxu1 %vm219_vm3, %v1010_v1 }
 0x3f7   :  { %1028 = vmatmul.msk.f32.gmra.mxu1 %vm219_vm3, %v1011_v2 }
 0x3ff   :  { %1029 = vmatmul.msk.f32.gmra.mxu1 %vm219_vm3, %v1012_v3 }
 0x444   :  { %v801_v4 = vpop.f32.mrf.mxu1 }
 0x445   :  { %v802_v32 = vadd.f32 %v801_v4, %v720_v31 }
 0x447   :  { %v825_v35 = vmax.f32 %v802_v32, 0.0 }
 0x44c   :  { %v804_v5 = vpop.f32.mrf.mxu1 }
 0x44d   :  { %v805_v29 = vadd.f32 %v804_v5, %v725_v28 }
 0x44f   :  { %v826_v34 = vmax.f32 %v805_v29, 0.0 }
 0x454   :  { %v807_v6 = vpop.f32.mrf.mxu1 }
 0x455   :  { %v808_v26 = vadd.f32 %v807_v6, %v730_v25 }
 0x457   :  { %v827_v33 = vmax.f32 %v808_v26, 0.0 }
 0x45c   :  { %v810_v7 = vpop.f32.mrf.mxu1 }
 0x45d   :  { %v811_v23 = vadd.f32 %v810_v7, %v735_v18 }
 0x45f   :  { %v828_v30 = vmax.f32 %v811_v23, 0.0 }
 0x464   :  { %v813_v8 = vpop.f32.mrf.mxu1 }
 0x465   :  { %v814_v21 = vadd.f32 %v813_v8, %v740_v14 }
 0x467   :  { %v829_v27 = vmax.f32 %v814_v21, 0.0 }
 0x46c   :  { %v816_v9 = vpop.f32.mrf.mxu1 }
 0x46d   :  { %v817_v19 = vadd.f32 %v816_v9, %v745_v13 }
 0x46f   :  { %v830_v24 = vmax.f32 %v817_v19, 0.0 }
 0x474   :  { %v819_v12 = vpop.f32.mrf.mxu1 }
 0x475   :  { %v820_v16 = vadd.f32 %v819_v12, %v750_v11 }
 0x477   :  { %v831_v22 = vmax.f32 %v820_v16, 0.0 }
 0x47c   :  { %v822_v15 = vpop.f32.mrf.mxu1 }
 0x47d   :  { %v823_v17 = vadd.f32 %v822_v15, %v755_v10 }
 0x47f   :  { %v832_v20 = vmax.f32 %v823_v17, 0.0 }
 0x481   :  { %1030 = vmatpush.msk.msra.mxu2 %vm244_vm2, %v832_v20 }
 0x483   :  { %855 = vmatpush.msra.mxu2 %v831_v22 }
 0x485   :  { %856 = vmatpush.msra.mxu2 %v830_v24 }
 0x487   :  { %857 = vmatpush.msra.mxu2 %v829_v27 }
 0x489   :  { %858 = vmatpush.msra.mxu2 %v828_v30 }
 0x48b   :  { %859 = vmatpush.msra.mxu2 %v827_v33 }
 0x48d   :  { %860 = vmatpush.msra.mxu2 %v826_v34 }
 0x48f   :  { %861 = vmatpush.msra.mxu2 %v825_v35 }
 0x490   :  { %1031 = vmatmul.msk.f32.vlgmr.msra.gmra.mxu2 %vm219_vm3, %v833_v36 }
 0x513   :  { %v863_v38 = vpop.f32.mrf.mxu2 }
 0x514   :  { %v864_v39 = vadd.f32 %v863_v38, %v838_v37 }
 0x516   :  { %v867_v40 = vrot.slane %v864_v39, 7 }
 0x518   :  { %v869_v41 = vsub.f32 %v864_v39, %v867_v40 }
 0x51a   :  { %v870_v42 = vsub.f32 0.0, %v869_v41 }
 0x51c   :  { %v871_v43 = vmul.f32 1.442695, %v870_v42 }
 0x51e   :  { %1047 = vpow2.f32 %v871_v43 }
 0x524   :  { %v1048_v44 = vpop.eup %1047 }
 0x525   :  { %v873_v45 = vadd.f32 1.0, %v1048_v44 }
 0x527   :  { %1049 = vrcp.f32 %v873_v45  ;;  %v885_v49 = vand.u32 2147483648, %v873_v45  ;;  %v883_v51 = vand.u32 2147483647, %v873_v45  ;;  %vm879_vm5 = vweird.f32 %v873_v45 }
 0x529   :  { %v886_v53 = vor.u32 1.1754944e-38, %v885_v49  ;;  %vm884_vm7 = vcmp.eq.f32.partialorder %v883_v51, 8.507059e+37 }
 0x52d   :  { %v1050_v46 = vpop.eup %1049 }
 0x52e   :  { %v875_v47 = vmul.f32 %v1050_v46, %v873_v45  ;;  %vm880_vm4 = vweird.f32 %v1050_v46 }
 0x52f   :  { %vm881_vm6 = vmor %vm879_vm5, %vm880_vm4 }
 0x530   :  { %v876_v48 = vsub.f32 1.0, %v875_v47 }
 0x532   :  { %v877_v50 = vmul.f32 %v1050_v46, %v876_v48 }
 0x534   :  { %v878_v52 = vadd.f32 %v1050_v46, %v877_v50 }
 0x536   :  { %v882_v54 = vsel %vm881_vm6, %v1050_v46, %v878_v52 }
 0x537   :  { %v887_v55 = vsel %vm884_vm7, %v886_v53, %v882_v54 }
 0x538   :  { %v889_v56 = vsub.f32 1.0, %v887_v55 }
 0x53a   :  { %v891_v57 = vrot.slane %v889_v56, 1 }
 0x53c   :  { %v893_v58 = vsel %vm110_vm0, %v891_v57, %v887_v55 }
 0x53d   :  { %895 = vst.msk [vmem:[#allocation2] sm:$0x3] %vm894_vm8, %v893_v58 }
 0x53e   :  { %906 = dma.vmem_to_hbm [thread:$0]  %s902_s13, 32, %s904_s4, [#allocation3]  }
 0x53f   :  { %1075 = dma.done.wait [#allocation3], 32  }
 0x540   :  { %1076 = vsyncadd [#allocation3], 4294967264 }
 0x541   :  { %911 = vsyncpa [#allocation3], 1 }

</bundles_post_ra>
